<compile_context>
chip_gen: v5e
topology: v5e:2x2
jax: 0.10.0
libtpu: 0.0.40
codegen_flags: <defaults>
</compile_context>

<pallas_src>
import functools

import jax
import jax.numpy as jnp
from jax.experimental import pallas as pl


C_PAD = 128          # lane-dense padded output-channel count
NEG = -1.0e30        # finite "-inf" for the max-pool mask (avoids inf*0 NaN)


# -----------------------------------------------------------------------------
# Fused Pallas kernel
# -----------------------------------------------------------------------------
def _cnn_fused_kernel(x_ref, w_ref, bconv_ref, wlin_ref, blin_ref, o_ref,
                      *, B, L_pad, C, S, kernel_sizes):
    """Fused TextCNN discriminator forward (one MXU matmul + VPU epilogue).

    x_ref    : (B*L_pad, ks_max*H)  bf16  wrapper-unfolded input windows
    w_ref    : (ks_max*H, C_PAD)    bf16  all branches' filters, lane-padded
    bconv_ref: (1, C_PAD)           f32   conv biases (padded with 0)
    wlin_ref : (1, C_PAD)           f32   final linear weights (padded with 0)
    blin_ref : (1, 1)               f32   final linear bias
    o_ref    : (B, C_PAD)           f32   logit broadcast across lanes
    """
    # Single MXU matmul: K = ks_max*H (all taps fused), M = B*L_pad (8-aligned).
    acc = jnp.dot(x_ref[...], w_ref[...],
                  preferred_element_type=jnp.float32)        # (M, C_PAD) f32

    # Fused epilogue, all f32 on the VPU: bias + leaky_relu(0.01).
    s = acc + bconv_ref[...]
    act = jnp.where(s > 0, s, 0.01 * s)

    # Per-branch validity mask generated in-kernel (static thresholds).
    l_idx = jax.lax.broadcasted_iota(jnp.int32, (L_pad, C_PAD), 0)
    c_idx = jax.lax.broadcasted_iota(jnp.int32, (L_pad, C_PAD), 1)
    thr = jnp.full((L_pad, C_PAD), L_pad, jnp.int32)          # padded lanes: valid
    for i, ks in enumerate(kernel_sizes):
        L_i = S - ks + 1
        thr = jnp.where((c_idx >= i * C) & (c_idx < (i + 1) * C), L_i, thr)
    valid = l_idx < thr                                        # (L_pad, C_PAD)

    # Global max-pool over time, per batch (tile-aligned reshape: L_pad % 8 == 0).
    act3 = act.reshape(B, L_pad, C_PAD)
    act3 = jnp.where(valid[None, :, :], act3, NEG)
    feats = jnp.max(act3, axis=1)                              # (B, C_PAD)

    # Final Linear (F -> 1): VPU multiply + cross-lane reduction, lane-dense out.
    logit = jnp.sum(feats * wlin_ref[...], axis=1, keepdims=True) + blin_ref[...]
    o_ref[...] = jnp.broadcast_to(logit, (B, C_PAD))


# -----------------------------------------------------------------------------
# Wrapper: pack parameters into the fused lane-dense layout and call the kernel
# -----------------------------------------------------------------------------
def _round_up(a, m):
    return (a + m - 1) // m * m


@functools.partial(jax.jit, static_argnames=("kernel_sizes",))
def cnn_forward(x, conv_weights, conv_biases, w_lin, b_lin, kernel_sizes):
    """Forward pass of the TextCNN discriminator.

    x            : (B, 1, seq_len, hidden)   float32
    conv_weights : tuple of (out_channels, 1, ks, hidden)
    conv_biases  : tuple of (out_channels,)
    w_lin        : (1, out_channels * len(kernel_sizes))
    b_lin        : (1,)
    returns      : (B, 1)
    """
    B, _, S, H = x.shape
    C = conv_weights[0].shape[0]
    n_br = len(kernel_sizes)
    ks_max = max(kernel_sizes)
    ks_min = min(kernel_sizes)
    assert S >= ks_max, "seq_len must be >= max(kernel_sizes)"
    L_max = S - ks_min + 1
    L_pad = _round_up(L_max, 8)          # 8-aligned time axis
    K = ks_max * H
    M = B * L_pad
    n_cols = n_br * C
    assert n_cols <= C_PAD

    # Wrapper-side unfold: x is tiny, so the ks_max-fold duplication is trivial
    # and it turns all conv branches into ONE K=ks_max*H matmul with aligned M.
    x2 = x[:, 0]                                               # (B, S, H)
    x2 = jnp.pad(x2, ((0, 0), (0, L_pad + ks_max - 1 - S), (0, 0)))
    x_unf = jnp.concatenate([x2[:, j:j + L_pad, :] for j in range(ks_max)],
                            axis=2)                            # (B, L_pad, K)
    x_unf = x_unf.reshape(M, K).astype(jnp.bfloat16)

    # Pack conv weights: branch i occupies columns [i*C, (i+1)*C) of C_PAD.
    w_cols = []
    for ks, w in zip(kernel_sizes, conv_weights):
        w_i = jnp.transpose(w[:, 0], (1, 2, 0))                # (ks, H, C)
        w_i = jnp.pad(w_i, ((0, ks_max - ks), (0, 0), (0, 0)))  # zero unused taps
        w_cols.append(w_i)
    w_taps = jnp.concatenate(w_cols, axis=2)                    # (ks_max, H, n_cols)
    w_taps = jnp.pad(w_taps, ((0, 0), (0, 0), (0, C_PAD - n_cols)))
    w_taps = w_taps.reshape(K, C_PAD).astype(jnp.bfloat16)

    b_comb = jnp.pad(jnp.concatenate(list(conv_biases)),
                     (0, C_PAD - n_cols)).reshape(1, C_PAD).astype(jnp.float32)
    wlin_comb = jnp.pad(w_lin[0], (0, C_PAD - n_cols)).reshape(1, C_PAD)
    wlin_comb = wlin_comb.astype(jnp.float32)
    blin2 = b_lin.reshape(1, 1).astype(jnp.float32)

    kernel = functools.partial(_cnn_fused_kernel, B=B, L_pad=L_pad, C=C, S=S,
                               kernel_sizes=kernel_sizes)

    out = pl.pallas_call(
        kernel,
        out_shape=jax.ShapeDtypeStruct((B, C_PAD), jnp.float32),
        in_specs=[
            pl.BlockSpec((M, K), lambda: (0, 0)),
            pl.BlockSpec((K, C_PAD), lambda: (0, 0)),
            pl.BlockSpec((1, C_PAD), lambda: (0, 0)),
            pl.BlockSpec((1, C_PAD), lambda: (0, 0)),
            pl.BlockSpec((1, 1), lambda: (0, 0)),
        ],
        out_specs=pl.BlockSpec((B, C_PAD), lambda: (0, 0)),
    )(x_unf, w_taps, b_comb, wlin_comb, blin2)

    return out[:, :1]                                           # (B, 1)


# -----------------------------------------------------------------------------
# Pure-JAX reference (for correctness check; f32 end-to-end)
# -----------------------------------------------------------------------------
def _unfold(x, ks):
    B, _, S, H = x.shape
    L = S - ks + 1
    x2 = x[:, 0]
    windows = jnp.stack([x2[:, t:t + L, :] for t in range(ks)], axis=2)
    return windows.reshape(B, L, ks * H)


def cnn_forward_ref(x, conv_weights, conv_biases, w_lin, b_lin, kernel_sizes):
    feats = []
    for ks, w, b in zip(kernel_sizes, conv_weights, conv_biases):
        C = w.shape[0]
        xu = _unfold(x, ks)                                    # (B, L, K)
        s = jnp.einsum("blk,ck->blc", xu, w.reshape(C, -1)) + b[None, None, :]
        act = jnp.where(s > 0, s, 0.01 * s)
        feats.append(jnp.max(act, axis=1))
    feats = jnp.concatenate(feats, axis=1)
    return feats @ w_lin.T + b_lin[None, :]


# -----------------------------------------------------------------------------
# Main
# -----------------------------------------------------------------------------
if __name__ == "__main__":
    # Module config (small, consistent with the forward contract)
    B = 2
    in_channels = 1
    seq_len = 16
    hidden_size = 32
    out_channels = 4
    kernel_sizes = (3, 4, 5)
    dropout = 0.1  # identity at inference

    key = jax.random.PRNGKey(0)
    k_x, k_w, k_b, k_lw, k_lb = jax.random.split(key, 5)

    x = jax.random.normal(k_x, (B, in_channels, seq_len, hidden_size),
                          jnp.float32)

    # Deterministic parameter init (uniform, PyTorch-like fan-in scaling)
    conv_weights, conv_biases = [], []
    wkeys = jax.random.split(k_w, len(kernel_sizes))
    bkeys = jax.random.split(k_b, len(kernel_sizes))
    for ks, kw, kb in zip(kernel_sizes, wkeys, bkeys):
        fan_in = in_channels * ks * hidden_size
        bound = 1.0 / jnp.sqrt(fan_in)
        conv_weights.append(
            jax.random.uniform(kw, (out_channels, in_channels, ks, hidden_size),
                               jnp.float32, -bound, bound))
        conv_biases.append(
            jax.random.uniform(kb, (out_channels,), jnp.float32, -bound, bound))

    lin_in = out_channels * len(kernel_sizes)
    lbound = 1.0 / jnp.sqrt(lin_in)
    w_lin = jax.random.uniform(k_lw, (1, lin_in), jnp.float32, -lbound, lbound)
    b_lin = jax.random.uniform(k_lb, (1,), jnp.float32, -lbound, lbound)

    out = cnn_forward(x, tuple(conv_weights), tuple(conv_biases),
                      w_lin, b_lin, kernel_sizes=kernel_sizes)
    out = jax.block_until_ready(out)

    ref = cnn_forward_ref(x, conv_weights, conv_biases, w_lin, b_lin,
                          kernel_sizes)
    assert out.shape == (B, 1), out.shape
    # Tolerance loosened vs. pure-f32 because MXU operands are bf16.
    assert jnp.allclose(out, ref, atol=5e-2, rtol=5e-2), (
        out, ref, jnp.max(jnp.abs(out - ref)))

    print("KERNEL_OK")
</pallas_src>

<mosaic_0001>
module attributes {stable_mosaic.version = 11 : i64} {
  func.func @_cnn_fused_kernel(%arg0: memref<32x160xbf16, #tpu.memory_space<vmem>>, %arg1: memref<160x128xbf16, #tpu.memory_space<vmem>>, %arg2: memref<1x128xf32, #tpu.memory_space<vmem>>, %arg3: memref<1x128xf32, #tpu.memory_space<vmem>>, %arg4: memref<1x1xf32, #tpu.memory_space<vmem>>, %arg5: memref<2x128xf32, #tpu.memory_space<vmem>>) attributes {dimension_semantics = [], scalar_prefetch = 0 : i64, scratch_operands = 0 : i64, tpu.core_type = #tpu.core_type<tc>} {
    %c0 = arith.constant 0 : index
    %c0_0 = arith.constant 0 : index
    %0 = vector.load %arg0[%c0, %c0_0] : memref<32x160xbf16, #tpu.memory_space<vmem>>, vector<32x160xbf16>
    %c0_1 = arith.constant 0 : index
    %c0_2 = arith.constant 0 : index
    %1 = vector.load %arg1[%c0_1, %c0_2] : memref<160x128xbf16, #tpu.memory_space<vmem>>, vector<160x128xbf16>
    %cst = arith.constant dense<0.000000e+00> : vector<32x128xf32>
    %2 = tpu.matmul %0, %1, %cst {dimension_numbers = #tpu.dot_dimension_numbers<[1], [0], [0], [1], [0, 0, 1, 1], [], []>} : vector<32x160xbf16>, vector<160x128xbf16>, vector<32x128xf32> -> vector<32x128xf32>
    %c0_3 = arith.constant 0 : index
    %c0_4 = arith.constant 0 : index
    %3 = vector.load %arg2[%c0_3, %c0_4] : memref<1x128xf32, #tpu.memory_space<vmem>>, vector<1x128xf32>
    %4 = vector.broadcast %3 : vector<1x128xf32> to vector<32x128xf32>
    %5 = arith.addf %2, %4 : vector<32x128xf32>
    %cst_5 = arith.constant 0.000000e+00 : f32
    %6 = vector.broadcast %cst_5 : f32 to vector<32x128xf32>
    %7 = arith.cmpf ogt, %5, %6 : vector<32x128xf32>
    %cst_6 = arith.constant 0.00999999977 : f32
    %8 = vector.broadcast %cst_6 : f32 to vector<32x128xf32>
    %9 = arith.mulf %8, %5 : vector<32x128xf32>
    %10 = arith.select %7, %5, %9 : vector<32x128xi1>, vector<32x128xf32>
    %11 = tpu.iota {dimensions = array<i32: 0>} : vector<16x128xi32>
    %12 = tpu.iota {dimensions = array<i32: 1>} : vector<16x128xi32>
    %c16_i32 = arith.constant 16 : i32
    %13 = vector.broadcast %c16_i32 : i32 to vector<16x128xi32>
    %c0_i32 = arith.constant 0 : i32
    %14 = vector.broadcast %c0_i32 : i32 to vector<16x128xi32>
    %15 = arith.cmpi sge, %12, %14 : vector<16x128xi32>
    %c4_i32 = arith.constant 4 : i32
    %16 = vector.broadcast %c4_i32 : i32 to vector<16x128xi32>
    %17 = arith.cmpi slt, %12, %16 : vector<16x128xi32>
    %18 = arith.andi %15, %17 : vector<16x128xi1>
    %c14_i32 = arith.constant 14 : i32
    %19 = vector.broadcast %c14_i32 : i32 to vector<16x128xi32>
    %20 = arith.select %18, %19, %13 : vector<16x128xi1>, vector<16x128xi32>
    %c4_i32_7 = arith.constant 4 : i32
    %21 = vector.broadcast %c4_i32_7 : i32 to vector<16x128xi32>
    %22 = arith.cmpi sge, %12, %21 : vector<16x128xi32>
    %c8_i32 = arith.constant 8 : i32
    %23 = vector.broadcast %c8_i32 : i32 to vector<16x128xi32>
    %24 = arith.cmpi slt, %12, %23 : vector<16x128xi32>
    %25 = arith.andi %22, %24 : vector<16x128xi1>
    %c13_i32 = arith.constant 13 : i32
    %26 = vector.broadcast %c13_i32 : i32 to vector<16x128xi32>
    %27 = arith.select %25, %26, %20 : vector<16x128xi1>, vector<16x128xi32>
    %c8_i32_8 = arith.constant 8 : i32
    %28 = vector.broadcast %c8_i32_8 : i32 to vector<16x128xi32>
    %29 = arith.cmpi sge, %12, %28 : vector<16x128xi32>
    %c12_i32 = arith.constant 12 : i32
    %30 = vector.broadcast %c12_i32 : i32 to vector<16x128xi32>
    %31 = arith.cmpi slt, %12, %30 : vector<16x128xi32>
    %32 = arith.andi %29, %31 : vector<16x128xi1>
    %c12_i32_9 = arith.constant 12 : i32
    %33 = vector.broadcast %c12_i32_9 : i32 to vector<16x128xi32>
    %34 = arith.select %32, %33, %27 : vector<16x128xi1>, vector<16x128xi32>
    %35 = arith.cmpi slt, %11, %34 : vector<16x128xi32>
    %36 = vector.shape_cast %10 : vector<32x128xf32> to vector<2x16x128xf32>
    %37 = vector.shape_cast %35 : vector<16x128xi1> to vector<1x16x128xi1>
    %cst_10 = arith.constant -1.000000e+30 : f32
    %38 = vector.shape_cast %37 : vector<1x16x128xi1> to vector<1x16x128xi1>
    %39 = vector.broadcast %38 : vector<1x16x128xi1> to vector<2x16x128xi1>
    %40 = vector.broadcast %cst_10 : f32 to vector<2x16x128xf32>
    %41 = arith.select %39, %36, %40 : vector<2x16x128xi1>, vector<2x16x128xf32>
    %cst_11 = arith.constant dense<0xFF800000> : vector<2x128xf32>
    %42 = vector.multi_reduction <maximumf>, %41, %cst_11 [1] : vector<2x16x128xf32> to vector<2x128xf32>
    %c0_12 = arith.constant 0 : index
    %c0_13 = arith.constant 0 : index
    %43 = vector.load %arg3[%c0_12, %c0_13] : memref<1x128xf32, #tpu.memory_space<vmem>>, vector<1x128xf32>
    %44 = vector.broadcast %43 : vector<1x128xf32> to vector<2x128xf32>
    %45 = arith.mulf %42, %44 : vector<2x128xf32>
    %cst_14 = arith.constant dense<0.000000e+00> : vector<2xf32>
    %46 = vector.multi_reduction <add>, %45, %cst_14 [1] : vector<2x128xf32> to vector<2xf32>
    %47 = vector.shape_cast %46 : vector<2xf32> to vector<2x1xf32>
    %c0_15 = arith.constant 0 : index
    %c0_16 = arith.constant 0 : index
    %48 = vector.load %arg4[%c0_15, %c0_16] : memref<1x1xf32, #tpu.memory_space<vmem>>, vector<1x1xf32>
    %49 = vector.broadcast %48 : vector<1x1xf32> to vector<2x1xf32>
    %50 = arith.addf %47, %49 : vector<2x1xf32>
    %51 = vector.shape_cast %50 : vector<2x1xf32> to vector<2x1xf32>
    %52 = vector.broadcast %51 : vector<2x1xf32> to vector<2x128xf32>
    %c0_17 = arith.constant 0 : index
    %c0_18 = arith.constant 0 : index
    %53 = vector.load %arg5[%c0_17, %c0_18] : memref<2x128xf32, #tpu.memory_space<vmem>>, vector<2x128xf32>
    tpu.vector_store %arg5[%c0_17, %c0_18], %52 {strides = array<i32>} : memref<2x128xf32, #tpu.memory_space<vmem>>, vector<2x128xf32>,
    return
  }
}

</mosaic_0001>

<bundles_post_ra>
// kernel: cnn_forward.1
= control target key start
LH: loop header
LB: loop body
LE: loop exit
PB: predicated region body
PF: predicated region fallthrough
CT: control target
= control target key end

     0   :  { %vm129_vm0 = vcmask 261120   ;;  %v186_v23 = vlaneseq  ;;  %v344_v29 = vmov 16   ;;  %vm236_vm14 = vcmask 1041409   ;;  %s448_s1 = inlined_call_operand.vmem [shape: bf16[160,128], index: 1, kind: input, shape index: {}]   ;;  %s449_s0 = inlined_call_operand.vmem [shape: bf16[32,160], index: 0, kind: input, shape index: {}]   ;;  %s450_s2 = inlined_call_operand.vmem [shape: f32[1,128], index: 2, kind: input, shape index: {}]   ;;  %s451_s3 = inlined_call_operand.vmem [shape: f32[1,128], index: 3, kind: input, shape index: {}]   ;;  %s452_s4 = inlined_call_operand.<no memory space> [shape: f32[1,1], index: 4, kind: input, shape index: {}]   ;;  %s453_s5 = inlined_call_operand.vmem [shape: f32[2,128], index: 5, kind: output, shape index: {}]  }
   0x1   :  { %v327_v0 = vld [vmem:[%s448_s1 + $0x38] sm:$0xff]  ;;  %v329_v1 = vld [vmem:[%s448_s1 + $0x48] sm:$0xff]  ;;  %v326_v2 = vld [vmem:[%s448_s1 + $0x30] sm:$0xff]  ;;  %v10_v44 = vstv %s452_s4  ;;  %vm239_vm15 = vcmask 1041408  }
   0x2   :  { %136 = vmatpush.bf16.msra.mxu0 %v327_v0  ;;  %330 = vmatpush.bf16.msra.mxu2 %v327_v0  ;;  %v328_v3 = vld [vmem:[%s448_s1 + $0x40] sm:$0xff]  ;;  %v262_v5 = vld [vmem:[%s449_s0 + $0x8] sm:$0xf0]  ;;  %v323_v9 = vld [vmem:[%s448_s1 + $0x18] sm:$0xff]  ;;  %v190_v25 = vand.u32 127, %v186_v23  ;;  %v187_v35 = vshrl.u32 %v186_v23, 7 }
   0x3   :  { %161 = vmatpush.bf16.msra.mxu1 %v329_v1  ;;  %v316_v4 = vld [vmem:[%s449_s0 + $0x4] sm:$0xf]  ;;  %v325_v6 = vld [vmem:[%s448_s1 + $0x28] sm:$0xff]  ;;  %v322_v10 = vld [vmem:[%s448_s1 + $0x10] sm:$0xff]  ;;  %11 = vst [vmem:[#allocation2] sm:$0x1] %v10_v44 }
   0x4   :  { %v265_v7 = vor.u32 %v316_v4, %v262_v5  ;;  %v324_v8 = vld [vmem:[%s448_s1 + $0x20] sm:$0xff]  ;;  %v318_v11 = vld [vmem:[%s449_s0 + $0x14] sm:$0xf]  ;;  %v270_v12 = vld [vmem:[%s449_s0 + $0x18] sm:$0xf0]  ;;  %vm192_vm1 = vcmp.lt.s32.totalorder %v190_v25, 4 }
   0x5   :  { %v321_v13 = vld [vmem:[%s448_s1 + $0x8] sm:$0xff]  ;;  %v273_v14 = vor.u32 %v318_v11, %v270_v12  ;;  %v320_v15 = vld [vmem:[%s448_s1] sm:$0xff]  ;;  %v268_v18 = vld [vmem:[%s449_s0 + $0x10] sm:$0xf]  ;;  %vm195_vm2 = vcmp.ge.s32.totalorder %v190_v25, 4  ;;  %vm196_vm3 = vcmp.lt.s32.totalorder %v190_v25, 8 }
   0x6   :  { %137 = vmatpush.bf16.msra.mxu0 %v326_v2  ;;  %331 = vmatpush.bf16.msra.mxu2 %v326_v2  ;;  %v260_v16 = vld [vmem:[%s449_s0] sm:$0xf]  ;;  %v317_v17 = vld [vmem:[%s449_s0 + $0x4] sm:$0xf0]  ;;  %v319_v19 = vld [vmem:[%s449_s0 + $0x14] sm:$0xf0] }
   0x7   :  { %162 = vmatpush.bf16.msra.mxu1 %v328_v3  ;;  %v261_v20 = vor.u32 %v317_v17, %v260_v16  ;;  %v269_v21 = vor.u32 %v319_v19, %v268_v18  ;;  %v341_v26 = vld [vmem:[%s450_s2] ss:$0 sm:$0xff]  ;;  %v194_v30 = vsel %vm192_vm1, 14, %v344_v29  ;;  %vm197_vm4 = vmand %vm195_vm2, %vm196_vm3  ;;  %vm199_vm5 = vcmp.ge.s32.totalorder %v190_v25, 8 }
   0x8   :  { %vm200_vm6 = vcmp.lt.s32.totalorder %v190_v25, 12  ;;  %v198_v32 = vsel %vm197_vm4, 13, %v194_v30  ;;  %v188_v41 = vadd.s32 8, %v187_v35  ;;  %v345_v16 = vmov 0  }
   0x9   :  { %vm201_vm7 = vmand %vm199_vm5, %vm200_vm6  ;;  %340 = vset.pattern.permute.xlu0 %v345_v16 }
   0xa   :  { %138 = vmatpush.bf16.msra.mxu0 %v325_v6  ;;  %332 = vmatpush.bf16.msra.mxu2 %v325_v6  ;;  %v202_v39 = vsel %vm201_vm7, 12, %v198_v32  ;;  %v343_v17 = vld [vmem:[#allocation2] ss:$0 sm:$0xff] }
   0xb   :  { %314 = vmatmul.msk.bf16.vlgmr.msra.gmra.mxu1 %vm129_vm0, %v265_v7  ;;  %vm203_vm9 = vcmp.lt.s32.totalorder %v187_v35, %v202_v39  ;;  %vm204_vm11 = vcmp.lt.s32.totalorder %v188_v41, %v202_v39 }
   0xe   :  { %139 = vmatpush.bf16.msra.mxu0 %v324_v8  ;;  %333 = vmatpush.bf16.msra.mxu2 %v324_v8 }
  0x12   :  { %140 = vmatpush.bf16.msra.mxu0 %v323_v9  ;;  %334 = vmatpush.bf16.msra.mxu2 %v323_v9 }
  0x16   :  { %141 = vmatpush.bf16.msra.mxu0 %v322_v10  ;;  %335 = vmatpush.bf16.msra.mxu2 %v322_v10  ;;  %v342_v10 = vld [vmem:[%s451_s3] ss:$0 sm:$0xff] }
  0x1a   :  { %142 = vmatpush.bf16.msra.mxu0 %v321_v13  ;;  %336 = vmatpush.bf16.msra.mxu2 %v321_v13 }
  0x1b   :  { %315 = vmatmul.msk.bf16.gmra.mxu1 %vm129_vm0, %v273_v14 }
  0x1e   :  { %143 = vmatpush.bf16.msra.mxu0 %v320_v15  ;;  %337 = vmatpush.bf16.msra.mxu2 %v320_v15 }
  0x21   :  { %144 = vmatmul.bf16.vlgmr.msra.gmra.mxu0 %v261_v20  ;;  %149 = vmatmul.bf16.vlgmr.msra.gmra.mxu2 %v269_v21 }
  0x88   :  { %v164_v22 = vpop.f32.mrf.mxu1 }
  0x90   :  { %v166_v24 = vpop.f32.mrf.mxu1 }
  0x98   :  { %v169_v33 = vpop.f32.mrf.mxu1 }
  0x9e   :  { %v145_v27 = vpop.f32.mrf.mxu0 }
  0x9f   :  { %v146_v28 = vadd.f32 %v341_v26, %v145_v27 }
  0xa0   :  { %v171_v53 = vpop.f32.mrf.mxu1 }
  0xa1   :  { %v165_v31 = vadd.f32 %v164_v22, %v146_v28 }
  0xa3   :  { %v178_v38 = vmul.f32 0.01, %v165_v31  ;;  %vm174_vm8 = vcmp.gt.f32.partialorder %v165_v31, 0.0 }
  0xa4   :  { %v150_v34 = vpop.f32.mrf.mxu2 }
  0xa5   :  { %v151_v36 = vadd.f32 %v341_v26, %v150_v34  ;;  %v182_v45 = vsel %vm174_vm8, %v165_v31, %v178_v38 }
  0xa6   :  { %v147_v37 = vpop.f32.mrf.mxu0  ;;  %v209_v51 = vsel %vm203_vm9, %v182_v45, -1e+30 }
  0xa7   :  { %v148_v40 = vadd.f32 %v341_v26, %v147_v37  ;;  %v170_v42 = vadd.f32 %v169_v33, %v151_v36 }
  0xa9   :  { %v167_v43 = vadd.f32 %v166_v24, %v148_v40  ;;  %v180_v48 = vmul.f32 0.01, %v170_v42  ;;  %vm176_vm12 = vcmp.gt.f32.partialorder %v170_v42, 0.0 }
  0xab   :  { %vm175_vm10 = vcmp.gt.f32.partialorder %v167_v43, 0.0  ;;  %v179_v46 = vmul.f32 0.01, %v167_v43  ;;  %v184_v56 = vsel %vm176_vm12, %v170_v42, %v180_v48 }
  0xac   :  { %v152_v47 = vpop.f32.mrf.mxu2  ;;  %v211_v61 = vsel %vm203_vm9, %v184_v56, -1e+30 }
  0xad   :  { %v183_v49 = vsel %vm175_vm10, %v167_v43, %v179_v46  ;;  %v153_v50 = vadd.f32 %v341_v26, %v152_v47 }
  0xae   :  { %v210_v52 = vsel %vm204_vm11, %v183_v49, -1e+30 }
  0xaf   :  { %v213_v54 = vmax.f32 %v209_v51, %v210_v52  ;;  %v172_v55 = vadd.f32 %v171_v53, %v153_v50 }
  0xb1   :  { %v214_v57 = vrot.slane %v213_v54, 4  ;;  %vm177_vm13 = vcmp.gt.f32.partialorder %v172_v55, 0.0  ;;  %v181_v58 = vmul.f32 0.01, %v172_v55 }
  0xb3   :  { %v215_v59 = vmax.f32 %v213_v54, %v214_v57  ;;  %v185_v60 = vsel %vm177_vm13, %v172_v55, %v181_v58 }
  0xb4   :  { %v212_v62 = vsel %vm204_vm11, %v185_v60, -1e+30 }
  0xb5   :  { %v220_v63 = vmax.f32 %v211_v61, %v212_v62  ;;  %v216_v0 = vrot.slane %v215_v59, 2 }
  0xb7   :  { %v221_v1 = vrot.slane %v220_v63, 4  ;;  %v217_v3 = vmax.f32 %v215_v59, %v216_v0 }
  0xb9   :  { %v222_v2 = vmax.f32 %v220_v63, %v221_v1  ;;  %v218_v5 = vrot.slane %v217_v3, 1 }
  0xbb   :  { %v223_v4 = vrot.slane %v222_v2, 2  ;;  %v219_v8 = vmax.f32 %v217_v3, %v218_v5 }
  0xbd   :  { %v224_v6 = vmax.f32 %v222_v2, %v223_v4  ;;  %v231_v12 = vmul.f32 %v342_v10, %v219_v8 }
  0xbf   :  { %v225_v7 = vrot.slane %v224_v6, 1 }
  0xc1   :  { %v226_v9 = vmax.f32 %v224_v6, %v225_v7 }
  0xc3   :  { %v232_v11 = vmul.f32 %v342_v10, %v226_v9 }
  0xc5   :  { %v235_v13 = vrot.slane %v232_v11, 7 }
  0xc7   :  { %v237_v14 = vsel %vm236_vm14, %v235_v13, %v231_v12 }
  0xc8   :  { %v240_v15 = vsel %vm239_vm15, %v237_v14, 0.0 }
  0xc9   :  { %241 = vadd.xlane.f32.xlu0 %v240_v15 }
 0x13c   :  { %v242_v18 = vpop.xlane.xlu0 %241 }
 0x13d   :  { %v247_v19 = vadd.f32 %v343_v17, %v242_v18 }
 0x13f   :  { %250 = vperm.xlu0 %340, %v247_v19  }
 0x1b1   :  { %v251_v20 = vpop.permute.xlu0 %250 }
 0x1b2   :  { %253 = vst [vmem:[%s453_s5] sm:$0x3] %v251_v20 }

</bundles_post_ra>
